<compile_context>
chip_gen: v6e
topology: v6e:2x2x1
jax: 0.10.0
libtpu: 0.0.40
codegen_flags: <defaults>
</compile_context>

<pallas_src>
import functools

import jax
import jax.numpy as jnp
from jax.experimental import pallas as pl
from jax.experimental.pallas import tpu as pltpu


def _vmem_budget_bytes():
    """Best-effort per-core VMEM budget (leave headroom for the compiler)."""
    cap = 128 * 1024 * 1024
    try:
        cap = int(pltpu.get_tpu_info().vmem_capacity_bytes)   # 64 MiB on v7x
    except Exception:
        pass
    return (3 * cap) // 4


def _pick_tile(dim, candidates, fits):
    """Largest candidate that divides `dim` and passes the VMEM estimate."""
    for t in candidates:
        if dim % t == 0 and fits(t):
            return t
    return None


def _const_spec(shape, single_buffer=False):
    """BlockSpec for a grid-invariant (resident) operand."""
    idx = lambda *_: (0,) * len(shape)
    if single_buffer:
        # Block index never changes -> double-buffering buys nothing; halves the
        # weight VMEM footprint (matters on v7x's 64 MiB VMEM).
        return pl.BlockSpec(shape, idx, pipeline_mode=pl.Buffered(1))
    return pl.BlockSpec(shape, idx)


def _layer_norm(x, w, b, eps=1e-5):
    # x: (rows, D) f32, w/b: (1, D). Matches torch.nn.LayerNorm (biased variance).
    mu = jnp.mean(x, axis=-1, keepdims=True)
    var = jnp.mean(jnp.square(x - mu), axis=-1, keepdims=True)
    return (x - mu) * jax.lax.rsqrt(var + eps) * w + b


# ---------------- kernel 1: fused QKV projection + attention core -----------------
def _qkv_attention_kernel(num_heads,
                          xq_ref, xkv_ref, wq_ref, bq_ref, wkv_ref, bkv_ref,
                          bias_ref, out_ref, k_sc, v_sc):
    # xq_ref:  (tq, D) bf16   query-row tile of the current batch
    # xkv_ref: (T, D)  bf16   full row slab of the current batch
    # wq_ref:  (D, D)  bf16   q-scale folded in; bq_ref (1, D) f32
    # wkv_ref: (D, 2D) bf16 ; bkv_ref (1, 2D) f32
    # bias_ref:(tq, T) f32    additive attn-mask + key-padding bias
    # out_ref: (tq, D) bf16   context rows (lane-dense)
    # k_sc/v_sc: (H, T, hd) bf16 VMEM scratch, carried across query tiles
    H = num_heads
    T, D = xkv_ref.shape
    hd = D // H
    qi = pl.program_id(1)

    def split_heads(x2d):
        # (rows, D) -> (H, rows, hd) via static lane slices; stays in VMEM.
        return jnp.stack([x2d[:, h * hd:(h + 1) * hd] for h in range(H)], axis=0)

    @pl.when(qi == 0)
    def _():
        # K/V projection for this batch's whole sequence, computed once (the
        # query-tile axis is the innermost, sequential grid axis) and kept
        # resident in VMEM scratch for all query tiles of this batch.
        kv = jnp.dot(xkv_ref[...], wkv_ref[...],
                     preferred_element_type=jnp.float32) + bkv_ref[...]
        k_sc[...] = split_heads(kv[:, :D]).astype(jnp.bfloat16)
        v_sc[...] = split_heads(kv[:, D:]).astype(jnp.bfloat16)

    # Q projection for this query tile (head_dim**-0.5 folded into wq/bq).
    q2 = jnp.dot(xq_ref[...], wq_ref[...],
                 preferred_element_type=jnp.float32) + bq_ref[...]
    q = split_heads(q2).astype(jnp.bfloat16)                    # (H, tq, hd)

    # All heads in one batched matmul, f32 accumulation.
    scores = jnp.einsum('hqd,hkd->hqk', q, k_sc[...],
                        preferred_element_type=jnp.float32)     # (H, tq, T)
    scores = scores + bias_ref[...][None]                       # additive bias

    # softmax over keys in f32 (padding bias is large-but-finite -> stays finite)
    m = jnp.max(scores, axis=-1, keepdims=True)
    e = jnp.exp(scores - m)
    denom = jnp.sum(e, axis=-1, keepdims=True)
    p = (e * pl.reciprocal(denom)).astype(jnp.bfloat16)         # (H, tq, T)

    ctx = jnp.einsum('hqk,hkd->hqd', p, v_sc[...],
                     preferred_element_type=jnp.float32)        # (H, tq, hd)
    # Merge heads back into a lane-dense (tq, D) block in-VMEM (no HBM transpose).
    out_ref[...] = jnp.concatenate([ctx[h] for h in range(H)],
                                   axis=-1).astype(out_ref.dtype)


# -------- kernel 2: out-proj + residual + LN1 + FFN + residual + LN2 (row-tiled) ---
def _postattn_ffn_kernel(ctx_ref, x_ref,
                         wo_ref, bo_ref, ln1w_ref, ln1b_ref,
                         w1_ref, b1_ref, w2_ref, b2_ref,
                         ln2w_ref, ln2b_ref, out_ref):
    # ctx_ref: (tm, D) bf16 ; x_ref: (tm, D) f32 residual ; weights bf16, biases/LN f32
    attn = jnp.dot(ctx_ref[...], wo_ref[...],
                   preferred_element_type=jnp.float32) + bo_ref[...]
    # dropout -> add residual -> layernorm   (dropout identity in eval)
    h1 = _layer_norm(x_ref[...].astype(jnp.float32) + attn, ln1w_ref[...], ln1b_ref[...])

    f = jnp.dot(h1.astype(jnp.bfloat16), w1_ref[...],
                preferred_element_type=jnp.float32) + b1_ref[...]
    f = jnp.maximum(f, 0.0)                                      # relu
    y = jnp.dot(f.astype(jnp.bfloat16), w2_ref[...],
                preferred_element_type=jnp.float32) + b2_ref[...]

    out_ref[...] = _layer_norm(h1 + y, ln2w_ref[...], ln2b_ref[...]).astype(out_ref.dtype)


# ------------------------------------ wrapper --------------------------------------
@functools.partial(jax.jit, static_argnames=('num_heads',))
def transformer_encoder_layer(x, key_padding_mask, attn_mask_binary, params, num_heads):
    """x: (T, B, D) f32; key_padding_mask: (B, T) f32 (1 == pad);
    attn_mask_binary: (T, T) f32 (1 == exclude) or None."""
    T, B, D = x.shape
    H = num_heads
    hd = D // H
    F = params['w1'].shape[1]
    N = B * T

    vmem_budget = _vmem_budget_bytes()

    # Additive attention mask exactly like the module (masked_fill -> -1e8), plus a
    # large-but-finite -1e9 key-padding bias, folded into one per-batch (T, T) bias
    # so the kernel does no per-step select/dynamic-slice.
    if attn_mask_binary is None:
        amask = jnp.zeros((T, T), jnp.float32)
    else:
        amask = jnp.where(attn_mask_binary > 0.5, jnp.float32(-1e8), jnp.float32(0.0))
    padb = jnp.where(key_padding_mask > 0.5, jnp.float32(-1e9), jnp.float32(0.0))
    bias_btt = amask[None, :, :] + padb[:, None, :]              # (B, T, T) f32
    # TODO(synk): for very long T / large B switch back to a (B, T) row bias to
    # avoid materializing the (B, T, T) array in HBM.

    # (T, B, D) -> (B, T, D) -> (B*T, D): lane-dense, batch-major rows.
    x_rows = jnp.transpose(x, (1, 0, 2)).reshape(N, D).astype(jnp.float32)
    x_rows_bf = x_rows.astype(jnp.bfloat16)      # bf16 feed for QKV (halves HBM reads)

    # Fold head_dim**-0.5 into Wq/bq; pack K/V weights; cast weights to bf16.
    scale = float(hd) ** -0.5
    wq = (params['wq'] * scale).astype(jnp.bfloat16)             # (D, D)
    bq = (params['bq'] * scale).astype(jnp.float32)              # (1, D)
    wkv = jnp.concatenate([params['wk'], params['wv']], axis=1).astype(jnp.bfloat16)
    bkv = jnp.concatenate([params['bk'], params['bv']], axis=1).astype(jnp.float32)

    # ---------------- phase 1: fused QKV projection + attention core ----------------
    attn_w_bytes = 3 * D * D * 2                                 # wq + wkv, bf16
    attn_single_buf = attn_w_bytes > (4 << 20)
    wbuf_a = 1 if attn_single_buf else 2

    def fits_attn(t):
        per_step = (3 * H * t * T * 4          # scores / exp / probs temporaries (f32)
                    + 2 * (t * D * 2) * 2      # q-row tile + ctx out, double-buffered bf16
                    + 2 * (t * T * 4))         # bias tile, double-buffered f32
        fixed = (2 * (T * D * 2)               # kv row slab, double-buffered bf16
                 + wbuf_a * attn_w_bytes       # resident projection weights
                 + 2 * (T * D * 2))            # K/V head scratch (bf16)
        return per_step + fixed <= vmem_budget

    # NOTE: requires T % 8 == 0 when B > 1 (block second-minor constraint); true for
    # the shapes this module sees.
    tq = _pick_tile(T, (256, 128, 64, 32, 16, 8), fits_attn) or T
    nq = T // tq

    attn_kernel = functools.partial(_qkv_attention_kernel, H)
    ctx_rows = pl.pallas_call(
        attn_kernel,
        out_shape=jax.ShapeDtypeStruct((N, D), jnp.bfloat16),
        grid=(B, nq),
        in_specs=[
            pl.BlockSpec((tq, D), lambda b, qi: (b * nq + qi, 0)),   # q rows of batch b
            pl.BlockSpec((T, D), lambda b, qi: (b, 0)),              # full rows of batch b
            _const_spec((D, D), attn_single_buf),                    # wq (scaled)
            _const_spec((1, D)),                                     # bq
            _const_spec((D, 2 * D), attn_single_buf),                # wkv
            _const_spec((1, 2 * D)),                                 # bkv
            pl.BlockSpec((None, tq, T), lambda b, qi: (b, qi, 0)),   # additive bias
        ],
        out_specs=pl.BlockSpec((tq, D), lambda b, qi: (b * nq + qi, 0)),
        scratch_shapes=[pltpu.VMEM((H, T, hd), jnp.bfloat16),        # K heads (carried)
                        pltpu.VMEM((H, T, hd), jnp.bfloat16)],       # V heads (carried)
        compiler_params=pltpu.CompilerParams(
            # The query-tile axis must stay sequential ("arbitrary"): the K/V scratch
            # computed at qi == 0 is reused across query tiles of the same batch.
            # TODO(synk): on v7x with tiny/odd B, recompute K/V per tile and mark both
            # axes "parallel" for better 2-TC balance.
            dimension_semantics=("parallel", "arbitrary"),
            vmem_limit_bytes=vmem_budget),
    )(x_rows_bf, x_rows_bf, wq, bq, wkv, bkv, bias_btt)

    # ------- phase 2: out-proj + residual + LN1 + FFN + residual + LN2 -------
    ffn_w_bytes = (D * D + 2 * D * F) * 2                        # wo + w1 + w2, bf16
    ffn_single_buf = ffn_w_bytes > (4 << 20)
    wbuf_f = 1 if ffn_single_buf else 2

    def fits_ffn(t):
        per_step = (2 * (t * F * 4)            # FFN intermediate (+ relu copy), f32
                    + 4 * (t * D * 4)          # h1 / residual / output tiles, f32
                    + 2 * (t * D * 2))         # ctx tile, double-buffered bf16
        fixed = wbuf_f * ffn_w_bytes
        return per_step + fixed <= vmem_budget

    tm = _pick_tile(N, (512, 256, 128, 64, 32, 16, 8), fits_ffn)
    if tm is None:
        # Nothing divides N (or fits): pad rows wrapper-side to a fitting tile so we
        # never fall into a pathological full-N single-step pipeline.
        tm = next((t for t in (256, 128, 64, 32, 16, 8) if fits_ffn(t)), 8)
    n_pad = ((N + tm - 1) // tm) * tm

    ctx_p = ctx_rows if n_pad == N else jnp.pad(ctx_rows, ((0, n_pad - N), (0, 0)))
    x_p = x_rows if n_pad == N else jnp.pad(x_rows, ((0, n_pad - N), (0, 0)))

    out_rows = pl.pallas_call(
        _postattn_ffn_kernel,
        out_shape=jax.ShapeDtypeStruct((n_pad, D), x.dtype),
        grid=(n_pad // tm,),
        in_specs=[
            pl.BlockSpec((tm, D), lambda i: (i, 0)),                 # ctx rows
            pl.BlockSpec((tm, D), lambda i: (i, 0)),                 # residual rows
            _const_spec((D, D), ffn_single_buf),                     # wo
            _const_spec((1, D)),                                     # bo
            _const_spec((1, D)),                                     # ln1 w
            _const_spec((1, D)),                                     # ln1 b
            _const_spec((D, F), ffn_single_buf),                     # w1
            _const_spec((1, F)),                                     # b1
            _const_spec((F, D), ffn_single_buf),                     # w2
            _const_spec((1, D)),                                     # b2
            _const_spec((1, D)),                                     # ln2 w
            _const_spec((1, D)),                                     # ln2 b
        ],
        out_specs=pl.BlockSpec((tm, D), lambda i: (i, 0)),
        compiler_params=pltpu.CompilerParams(
            dimension_semantics=("parallel",),
            vmem_limit_bytes=vmem_budget),
    )(ctx_p, x_p,
      params['wo'].astype(jnp.bfloat16), params['bo'],
      params['ln1_w'], params['ln1_b'],
      params['w1'].astype(jnp.bfloat16), params['b1'],
      params['w2'].astype(jnp.bfloat16), params['b2'],
      params['ln2_w'], params['ln2_b'])

    return out_rows[:N].reshape(B, T, D).transpose(1, 0, 2)          # back to (T, B, D)


# ---------------- pure-JAX f32 reference (mirrors fairseq semantics) ----------------
def reference(x, pad_mask, attn_mask_binary, p, H):
    T, B, D = x.shape
    hd = D // H
    scale = float(hd) ** -0.5
    amask = jnp.where(attn_mask_binary > 0.5, -1e8, 0.0).astype(jnp.float32)

    x2d = x.reshape(T * B, D)
    q = (x2d @ p['wq'] + p['bq']) * scale
    k = x2d @ p['wk'] + p['bk']
    v = x2d @ p['wv'] + p['bv']
    q = q.reshape(T, B, H, hd).transpose(1, 2, 0, 3)      # (B,H,T,hd)
    k = k.reshape(T, B, H, hd).transpose(1, 2, 0, 3)
    v = v.reshape(T, B, H, hd).transpose(1, 2, 0, 3)
    scores = jnp.einsum('bhtd,bhsd->bhts', q, k) + amask[None, None]
    scores = scores + jnp.where(pad_mask[:, None, None, :] > 0.5, -1e9, 0.0)
    probs = jax.nn.softmax(scores, axis=-1)
    ctx = jnp.einsum('bhts,bhsd->bhtd', probs, v)         # (B,H,T,hd)
    ctx = ctx.transpose(2, 0, 1, 3).reshape(T * B, D)
    attn = ctx @ p['wo'] + p['bo']

    def ln(y, w, b):
        mu = y.mean(-1, keepdims=True)
        var = ((y - mu) ** 2).mean(-1, keepdims=True)
        return (y - mu) / jnp.sqrt(var + 1e-5) * w + b

    h1 = ln(x2d + attn, p['ln1_w'], p['ln1_b'])
    f = jnp.maximum(h1 @ p['w1'] + p['b1'], 0.0) @ p['w2'] + p['b2']
    out = ln(h1 + f, p['ln2_w'], p['ln2_b'])
    return out.reshape(T, B, D)


if __name__ == "__main__":
    # Small shapes consistent with the module's forward: (seq, batch, embed).
    T, B, D, H, F = 8, 2, 32, 4, 64

    key = jax.random.PRNGKey(0)
    keys = jax.random.split(key, 12)

    def lin(k, din, dout, scale=0.1):
        # Weights stored pre-transposed as (in, out); PyTorch nn.Linear stores (out, in).
        return jax.random.normal(k, (din, dout), jnp.float32) * scale

    params = {
        'wq': lin(keys[0], D, D), 'bq': jnp.zeros((1, D), jnp.float32),
        'wk': lin(keys[1], D, D), 'bk': jnp.zeros((1, D), jnp.float32),
        'wv': lin(keys[2], D, D), 'bv': jnp.zeros((1, D), jnp.float32),
        'wo': lin(keys[3], D, D), 'bo': jax.random.normal(keys[4], (1, D), jnp.float32) * 0.01,
        'ln1_w': jnp.ones((1, D), jnp.float32), 'ln1_b': jnp.zeros((1, D), jnp.float32),
        'w1': lin(keys[5], D, F), 'b1': jax.random.normal(keys[6], (1, F), jnp.float32) * 0.01,
        'w2': lin(keys[7], F, D), 'b2': jax.random.normal(keys[8], (1, D), jnp.float32) * 0.01,
        'ln2_w': jnp.ones((1, D), jnp.float32), 'ln2_b': jnp.zeros((1, D), jnp.float32),
    }

    x = jax.random.normal(keys[9], (T, B, D), jnp.float32)

    # key_padding_mask: last two positions of batch 1 are padding.
    pad_mask = jnp.zeros((B, T), jnp.float32).at[1, T - 2:].set(1.0)

    # attn_mask: exclude a couple of (tgt, src) pairs (binary, 1 == exclude).
    attn_mask = jnp.zeros((T, T), jnp.float32).at[0, 5].set(1.0).at[3, 1].set(1.0)

    out = transformer_encoder_layer(x, pad_mask, attn_mask, params, H)
    out = jax.block_until_ready(out)

    ref = reference(x, pad_mask, attn_mask, params, H)
    assert out.shape == (T, B, D)
    assert bool(jnp.all(jnp.isfinite(out))), "non-finite output"
    # bf16 MXU operands with f32 accumulation -> relaxed tolerance vs the f32 reference.
    assert jnp.allclose(out, ref, atol=5e-2, rtol=5e-2), "mismatch vs reference"

    # TODO(synk): dropout / activation-dropout are stochastic (train-mode) and are
    # implemented as identity (eval-mode semantics), matching module.eval().
    print("KERNEL_OK")
</pallas_src>

<mosaic_0001>
module attributes {stable_mosaic.version = 11 : i64} {
  func.func @_qkv_attention_kernel(%arg0: i32, %arg1: i32, %arg2: memref<8x32xbf16, #tpu.memory_space<vmem>>, %arg3: memref<8x32xbf16, #tpu.memory_space<vmem>>, %arg4: memref<32x32xbf16, #tpu.memory_space<vmem>>, %arg5: memref<1x32xf32, #tpu.memory_space<vmem>>, %arg6: memref<32x64xbf16, #tpu.memory_space<vmem>>, %arg7: memref<1x64xf32, #tpu.memory_space<vmem>>, %arg8: memref<1x8x8xf32, #tpu.memory_space<vmem>>, %arg9: memref<8x32xbf16, #tpu.memory_space<vmem>>, %arg10: memref<4x8x8xbf16, #tpu.memory_space<vmem>>, %arg11: memref<4x8x8xbf16, #tpu.memory_space<vmem>>) attributes {dimension_semantics = [#tpu.dimension_semantics<parallel>, #tpu.dimension_semantics<arbitrary>], iteration_bounds = array<i64: 2, 1>, scalar_prefetch = 0 : i64, scratch_operands = 2 : i64, tpu.core_type = #tpu.core_type<tc>, window_params = [{transform_indices = @transform_0, window_bounds = array<i64: 8, 32>}, {transform_indices = @transform_1, window_bounds = array<i64: 8, 32>}, {pipeline_mode = #tpu.pipeline_mode<synchronous>, transform_indices = @transform_2, window_bounds = array<i64: 32, 32>}, {pipeline_mode = #tpu.pipeline_mode<synchronous>, transform_indices = @transform_3, window_bounds = array<i64: 1, 32>}, {pipeline_mode = #tpu.pipeline_mode<synchronous>, transform_indices = @transform_4, window_bounds = array<i64: 32, 64>}, {pipeline_mode = #tpu.pipeline_mode<synchronous>, transform_indices = @transform_5, window_bounds = array<i64: 1, 64>}, {transform_indices = @transform_6, window_bounds = array<i64: 1, 8, 8>}, {transform_indices = @transform_7, window_bounds = array<i64: 8, 32>}]} {
    %c0_i32 = arith.constant 0 : i32
    %0 = arith.cmpi eq, %arg1, %c0_i32 : i32
    %1 = arith.extui %0 : i1 to i32
    %c0_i32_0 = arith.constant 0 : i32
    %2 = arith.cmpi ne, %1, %c0_i32_0 : i32
    scf.if %2 {
      %c0_21 = arith.constant 0 : index
      %c0_22 = arith.constant 0 : index
      %50 = vector.load %arg3[%c0_21, %c0_22] : memref<8x32xbf16, #tpu.memory_space<vmem>>, vector<8x32xbf16>
      %c0_23 = arith.constant 0 : index
      %c0_24 = arith.constant 0 : index
      %51 = vector.load %arg6[%c0_23, %c0_24] : memref<32x64xbf16, #tpu.memory_space<vmem>>, vector<32x64xbf16>
      %cst_25 = arith.constant dense<0.000000e+00> : vector<8x64xf32>
      %52 = tpu.matmul %50, %51, %cst_25 {dimension_numbers = #tpu.dot_dimension_numbers<[1], [0], [0], [1], [0, 0, 1, 1], [], []>} : vector<8x32xbf16>, vector<32x64xbf16>, vector<8x64xf32> -> vector<8x64xf32>
      %c0_26 = arith.constant 0 : index
      %c0_27 = arith.constant 0 : index
      %53 = vector.load %arg7[%c0_26, %c0_27] : memref<1x64xf32, #tpu.memory_space<vmem>>, vector<1x64xf32>
      %54 = vector.broadcast %53 : vector<1x64xf32> to vector<8x64xf32>
      %55 = arith.addf %52, %54 : vector<8x64xf32>
      %56 = vector.extract_strided_slice %55 {offsets = [0, 0], sizes = [8, 32], strides = [1, 1]} : vector<8x64xf32> to vector<8x32xf32>
      %57 = vector.extract_strided_slice %56 {offsets = [0, 0], sizes = [8, 8], strides = [1, 1]} : vector<8x32xf32> to vector<8x8xf32>
      %58 = vector.extract_strided_slice %56 {offsets = [0, 8], sizes = [8, 8], strides = [1, 1]} : vector<8x32xf32> to vector<8x8xf32>
      %59 = vector.extract_strided_slice %56 {offsets = [0, 16], sizes = [8, 8], strides = [1, 1]} : vector<8x32xf32> to vector<8x8xf32>
      %60 = vector.extract_strided_slice %56 {offsets = [0, 24], sizes = [8, 8], strides = [1, 1]} : vector<8x32xf32> to vector<8x8xf32>
      %61 = vector.shape_cast %57 : vector<8x8xf32> to vector<1x8x8xf32>
      %62 = vector.shape_cast %58 : vector<8x8xf32> to vector<1x8x8xf32>
      %63 = vector.shape_cast %59 : vector<8x8xf32> to vector<1x8x8xf32>
      %64 = vector.shape_cast %60 : vector<8x8xf32> to vector<1x8x8xf32>
      %65 = tpu.concatenate %61, %62, %63, %64 in 0 : vector<1x8x8xf32>, vector<1x8x8xf32>, vector<1x8x8xf32>, vector<1x8x8xf32> -> vector<4x8x8xf32>
      %66 = arith.truncf %65 : vector<4x8x8xf32> to vector<4x8x8xbf16>
      %c0_28 = arith.constant 0 : index
      %c0_29 = arith.constant 0 : index
      %c0_30 = arith.constant 0 : index
      %67 = vector.load %arg10[%c0_28, %c0_29, %c0_30] : memref<4x8x8xbf16, #tpu.memory_space<vmem>>, vector<4x8x8xbf16>
      tpu.vector_store %arg10[%c0_28, %c0_29, %c0_30], %66 {strides = array<i32>} : memref<4x8x8xbf16, #tpu.memory_space<vmem>>, vector<4x8x8xbf16>,
      %68 = vector.extract_strided_slice %55 {offsets = [0, 32], sizes = [8, 32], strides = [1, 1]} : vector<8x64xf32> to vector<8x32xf32>
      %69 = vector.extract_strided_slice %68 {offsets = [0, 0], sizes = [8, 8], strides = [1, 1]} : vector<8x32xf32> to vector<8x8xf32>
      %70 = vector.extract_strided_slice %68 {offsets = [0, 8], sizes = [8, 8], strides = [1, 1]} : vector<8x32xf32> to vector<8x8xf32>
      %71 = vector.extract_strided_slice %68 {offsets = [0, 16], sizes = [8, 8], strides = [1, 1]} : vector<8x32xf32> to vector<8x8xf32>
      %72 = vector.extract_strided_slice %68 {offsets = [0, 24], sizes = [8, 8], strides = [1, 1]} : vector<8x32xf32> to vector<8x8xf32>
      %73 = vector.shape_cast %69 : vector<8x8xf32> to vector<1x8x8xf32>
      %74 = vector.shape_cast %70 : vector<8x8xf32> to vector<1x8x8xf32>
      %75 = vector.shape_cast %71 : vector<8x8xf32> to vector<1x8x8xf32>
      %76 = vector.shape_cast %72 : vector<8x8xf32> to vector<1x8x8xf32>
      %77 = tpu.concatenate %73, %74, %75, %76 in 0 : vector<1x8x8xf32>, vector<1x8x8xf32>, vector<1x8x8xf32>, vector<1x8x8xf32> -> vector<4x8x8xf32>
      %78 = arith.truncf %77 : vector<4x8x8xf32> to vector<4x8x8xbf16>
      %c0_31 = arith.constant 0 : index
      %c0_32 = arith.constant 0 : index
      %c0_33 = arith.constant 0 : index
      %79 = vector.load %arg11[%c0_31, %c0_32, %c0_33] : memref<4x8x8xbf16, #tpu.memory_space<vmem>>, vector<4x8x8xbf16>
      tpu.vector_store %arg11[%c0_31, %c0_32, %c0_33], %78 {strides = array<i32>} : memref<4x8x8xbf16, #tpu.memory_space<vmem>>, vector<4x8x8xbf16>,
    } else {
    }
    %c0 = arith.constant 0 : index
    %c0_1 = arith.constant 0 : index
    %3 = vector.load %arg2[%c0, %c0_1] : memref<8x32xbf16, #tpu.memory_space<vmem>>, vector<8x32xbf16>
    %c0_2 = arith.constant 0 : index
    %c0_3 = arith.constant 0 : index
    %4 = vector.load %arg4[%c0_2, %c0_3] : memref<32x32xbf16, #tpu.memory_space<vmem>>, vector<32x32xbf16>
    %cst = arith.constant dense<0.000000e+00> : vector<8x32xf32>
    %5 = tpu.matmul %3, %4, %cst {dimension_numbers = #tpu.dot_dimension_numbers<[1], [0], [0], [1], [0, 0, 1, 1], [], []>} : vector<8x32xbf16>, vector<32x32xbf16>, vector<8x32xf32> -> vector<8x32xf32>
    %c0_4 = arith.constant 0 : index
    %c0_5 = arith.constant 0 : index
    %6 = vector.load %arg5[%c0_4, %c0_5] : memref<1x32xf32, #tpu.memory_space<vmem>>, vector<1x32xf32>
    %7 = vector.broadcast %6 : vector<1x32xf32> to vector<8x32xf32>
    %8 = arith.addf %5, %7 : vector<8x32xf32>
    %9 = vector.extract_strided_slice %8 {offsets = [0, 0], sizes = [8, 8], strides = [1, 1]} : vector<8x32xf32> to vector<8x8xf32>
    %10 = vector.extract_strided_slice %8 {offsets = [0, 8], sizes = [8, 8], strides = [1, 1]} : vector<8x32xf32> to vector<8x8xf32>
    %11 = vector.extract_strided_slice %8 {offsets = [0, 16], sizes = [8, 8], strides = [1, 1]} : vector<8x32xf32> to vector<8x8xf32>
    %12 = vector.extract_strided_slice %8 {offsets = [0, 24], sizes = [8, 8], strides = [1, 1]} : vector<8x32xf32> to vector<8x8xf32>
    %13 = vector.shape_cast %9 : vector<8x8xf32> to vector<1x8x8xf32>
    %14 = vector.shape_cast %10 : vector<8x8xf32> to vector<1x8x8xf32>
    %15 = vector.shape_cast %11 : vector<8x8xf32> to vector<1x8x8xf32>
    %16 = vector.shape_cast %12 : vector<8x8xf32> to vector<1x8x8xf32>
    %17 = tpu.concatenate %13, %14, %15, %16 in 0 : vector<1x8x8xf32>, vector<1x8x8xf32>, vector<1x8x8xf32>, vector<1x8x8xf32> -> vector<4x8x8xf32>
    %18 = arith.truncf %17 : vector<4x8x8xf32> to vector<4x8x8xbf16>
    %c0_6 = arith.constant 0 : index
    %c0_7 = arith.constant 0 : index
    %c0_8 = arith.constant 0 : index
    %19 = vector.load %arg10[%c0_6, %c0_7, %c0_8] : memref<4x8x8xbf16, #tpu.memory_space<vmem>>, vector<4x8x8xbf16>
    "tpu.trace_start"() <{level = 10 : i32, message = "hqd,hkd->hqk"}> : () -> ()
    %cst_9 = arith.constant dense<0.000000e+00> : vector<4x8x8xf32>
    %20 = tpu.matmul %18, %19, %cst_9 {dimension_numbers = #tpu.dot_dimension_numbers<[2], [2], [1], [1], [0, 0, 0, 1, 1, 1], [0], [0]>} : vector<4x8x8xbf16>, vector<4x8x8xbf16>, vector<4x8x8xf32> -> vector<4x8x8xf32>
    "tpu.trace_stop"() : () -> ()
    %c0_10 = arith.constant 0 : index
    %c0_11 = arith.constant 0 : index
    %c0_12 = arith.constant 0 : index
    %21 = vector.load %arg8[%c0_10, %c0_11, %c0_12] : memref<1x8x8xf32, #tpu.memory_space<vmem>>, vector<1x8x8xf32>
    %22 = vector.shape_cast %21 : vector<1x8x8xf32> to vector<8x8xf32>
    %23 = vector.shape_cast %22 : vector<8x8xf32> to vector<1x8x8xf32>
    %24 = vector.broadcast %23 : vector<1x8x8xf32> to vector<4x8x8xf32>
    %25 = arith.addf %20, %24 : vector<4x8x8xf32>
    %cst_13 = arith.constant dense<0xFF800000> : vector<4x8xf32>
    %26 = vector.multi_reduction <maximumf>, %25, %cst_13 [2] : vector<4x8x8xf32> to vector<4x8xf32>
    %27 = vector.shape_cast %26 : vector<4x8xf32> to vector<4x8x1xf32>
    %28 = vector.broadcast %27 : vector<4x8x1xf32> to vector<4x8x8xf32>
    %29 = arith.subf %25, %28 : vector<4x8x8xf32>
    %30 = math.exp %29 : vector<4x8x8xf32>
    %cst_14 = arith.constant dense<0.000000e+00> : vector<4x8xf32>
    %31 = vector.multi_reduction <add>, %30, %cst_14 [2] : vector<4x8x8xf32> to vector<4x8xf32>
    %32 = vector.shape_cast %31 : vector<4x8xf32> to vector<4x8x1xf32>
    %33 = tpu.reciprocal %32 : vector<4x8x1xf32> -> vector<4x8x1xf32>
    %34 = vector.broadcast %33 : vector<4x8x1xf32> to vector<4x8x8xf32>
    %35 = arith.mulf %30, %34 : vector<4x8x8xf32>
    %36 = arith.truncf %35 : vector<4x8x8xf32> to vector<4x8x8xbf16>
    %c0_15 = arith.constant 0 : index
    %c0_16 = arith.constant 0 : index
    %c0_17 = arith.constant 0 : index
    %37 = vector.load %arg11[%c0_15, %c0_16, %c0_17] : memref<4x8x8xbf16, #tpu.memory_space<vmem>>, vector<4x8x8xbf16>
    "tpu.trace_start"() <{level = 10 : i32, message = "hqk,hkd->hqd"}> : () -> ()
    %cst_18 = arith.constant dense<0.000000e+00> : vector<4x8x8xf32>
    %38 = tpu.matmul %36, %37, %cst_18 {dimension_numbers = #tpu.dot_dimension_numbers<[2], [1], [1], [2], [0, 0, 0, 1, 1, 2], [0], [0]>} : vector<4x8x8xbf16>, vector<4x8x8xbf16>, vector<4x8x8xf32> -> vector<4x8x8xf32>
    "tpu.trace_stop"() : () -> ()
    %39 = vector.extract_strided_slice %38 {offsets = [0, 0, 0], sizes = [1, 8, 8], strides = [1, 1, 1]} : vector<4x8x8xf32> to vector<1x8x8xf32>
    %40 = vector.shape_cast %39 : vector<1x8x8xf32> to vector<8x8xf32>
    %41 = vector.extract_strided_slice %38 {offsets = [1, 0, 0], sizes = [1, 8, 8], strides = [1, 1, 1]} : vector<4x8x8xf32> to vector<1x8x8xf32>
    %42 = vector.shape_cast %41 : vector<1x8x8xf32> to vector<8x8xf32>
    %43 = vector.extract_strided_slice %38 {offsets = [2, 0, 0], sizes = [1, 8, 8], strides = [1, 1, 1]} : vector<4x8x8xf32> to vector<1x8x8xf32>
    %44 = vector.shape_cast %43 : vector<1x8x8xf32> to vector<8x8xf32>
    %45 = vector.extract_strided_slice %38 {offsets = [3, 0, 0], sizes = [1, 8, 8], strides = [1, 1, 1]} : vector<4x8x8xf32> to vector<1x8x8xf32>
    %46 = vector.shape_cast %45 : vector<1x8x8xf32> to vector<8x8xf32>
    %47 = tpu.concatenate %40, %42, %44, %46 in 1 : vector<8x8xf32>, vector<8x8xf32>, vector<8x8xf32>, vector<8x8xf32> -> vector<8x32xf32>
    %48 = arith.truncf %47 : vector<8x32xf32> to vector<8x32xbf16>
    %c0_19 = arith.constant 0 : index
    %c0_20 = arith.constant 0 : index
    %49 = vector.load %arg9[%c0_19, %c0_20] : memref<8x32xbf16, #tpu.memory_space<vmem>>, vector<8x32xbf16>
    tpu.vector_store %arg9[%c0_19, %c0_20], %48 {strides = array<i32>} : memref<8x32xbf16, #tpu.memory_space<vmem>>, vector<8x32xbf16>,
    return
  }
  func.func @transform_0(%arg0: i32, %arg1: i32) -> (i32, i32) {
    %c1_i32 = arith.constant 1 : i32
    %0 = arith.muli %arg0, %c1_i32 : i32
    %1 = arith.addi %0, %arg1 : i32
    %c0_i32 = arith.constant 0 : i32
    %c0_i32_0 = arith.constant 0 : i32
    return %1, %c0_i32 : i32, i32
  }
  func.func @transform_1(%arg0: i32, %arg1: i32) -> (i32, i32) {
    %c0_i32 = arith.constant 0 : i32
    %c0_i32_0 = arith.constant 0 : i32
    return %arg0, %c0_i32 : i32, i32
  }
  func.func @transform_2(%arg0: i32, %arg1: i32) -> (i32, i32) {
    %c0_i32 = arith.constant 0 : i32
    %c0_i32_0 = arith.constant 0 : i32
    %c0_i32_1 = arith.constant 0 : i32
    return %c0_i32, %c0_i32_0 : i32, i32
  }
  func.func @transform_3(%arg0: i32, %arg1: i32) -> (i32, i32) {
    %c0_i32 = arith.constant 0 : i32
    %c0_i32_0 = arith.constant 0 : i32
    %c0_i32_1 = arith.constant 0 : i32
    return %c0_i32, %c0_i32_0 : i32, i32
  }
  func.func @transform_4(%arg0: i32, %arg1: i32) -> (i32, i32) {
    %c0_i32 = arith.constant 0 : i32
    %c0_i32_0 = arith.constant 0 : i32
    %c0_i32_1 = arith.constant 0 : i32
    return %c0_i32, %c0_i32_0 : i32, i32
  }
  func.func @transform_5(%arg0: i32, %arg1: i32) -> (i32, i32) {
    %c0_i32 = arith.constant 0 : i32
    %c0_i32_0 = arith.constant 0 : i32
    %c0_i32_1 = arith.constant 0 : i32
    return %c0_i32, %c0_i32_0 : i32, i32
  }
  func.func @transform_6(%arg0: i32, %arg1: i32) -> (i32, i32, i32) {
    %c0_i32 = arith.constant 0 : i32
    %c0_i32_0 = arith.constant 0 : i32
    return %arg0, %arg1, %c0_i32 : i32, i32, i32
  }
  func.func @transform_7(%arg0: i32, %arg1: i32) -> (i32, i32) {
    %c1_i32 = arith.constant 1 : i32
    %0 = arith.muli %arg0, %c1_i32 : i32
    %1 = arith.addi %0, %arg1 : i32
    %c0_i32 = arith.constant 0 : i32
    %c0_i32_0 = arith.constant 0 : i32
    return %1, %c0_i32 : i32, i32
  }
}

module attributes {stable_mosaic.version = 11 : i64} {
  func.func @_postattn_ffn_kernel(%arg0: i32, %arg1: memref<16x32xbf16, #tpu.memory_space<vmem>>, %arg2: memref<16x32xf32, #tpu.memory_space<vmem>>, %arg3: memref<32x32xbf16, #tpu.memory_space<vmem>>, %arg4: memref<1x32xf32, #tpu.memory_space<vmem>>, %arg5: memref<1x32xf32, #tpu.memory_space<vmem>>, %arg6: memref<1x32xf32, #tpu.memory_space<vmem>>, %arg7: memref<32x64xbf16, #tpu.memory_space<vmem>>, %arg8: memref<1x64xf32, #tpu.memory_space<vmem>>, %arg9: memref<64x32xbf16, #tpu.memory_space<vmem>>, %arg10: memref<1x32xf32, #tpu.memory_space<vmem>>, %arg11: memref<1x32xf32, #tpu.memory_space<vmem>>, %arg12: memref<1x32xf32, #tpu.memory_space<vmem>>, %arg13: memref<16x32xf32, #tpu.memory_space<vmem>>) attributes {dimension_semantics = [#tpu.dimension_semantics<parallel>], iteration_bounds = array<i64: 1>, scalar_prefetch = 0 : i64, scratch_operands = 0 : i64, tpu.core_type = #tpu.core_type<tc>, window_params = [{transform_indices = @transform_0, window_bounds = array<i64: 16, 32>}, {transform_indices = @transform_1, window_bounds = array<i64: 16, 32>}, {pipeline_mode = #tpu.pipeline_mode<synchronous>, transform_indices = @transform_2, window_bounds = array<i64: 32, 32>}, {pipeline_mode = #tpu.pipeline_mode<synchronous>, transform_indices = @transform_3, window_bounds = array<i64: 1, 32>}, {pipeline_mode = #tpu.pipeline_mode<synchronous>, transform_indices = @transform_4, window_bounds = array<i64: 1, 32>}, {pipeline_mode = #tpu.pipeline_mode<synchronous>, transform_indices = @transform_5, window_bounds = array<i64: 1, 32>}, {pipeline_mode = #tpu.pipeline_mode<synchronous>, transform_indices = @transform_6, window_bounds = array<i64: 32, 64>}, {pipeline_mode = #tpu.pipeline_mode<synchronous>, transform_indices = @transform_7, window_bounds = array<i64: 1, 64>}, {pipeline_mode = #tpu.pipeline_mode<synchronous>, transform_indices = @transform_8, window_bounds = array<i64: 64, 32>}, {pipeline_mode = #tpu.pipeline_mode<synchronous>, transform_indices = @transform_9, window_bounds = array<i64: 1, 32>}, {pipeline_mode = #tpu.pipeline_mode<synchronous>, transform_indices = @transform_10, window_bounds = array<i64: 1, 32>}, {pipeline_mode = #tpu.pipeline_mode<synchronous>, transform_indices = @transform_11, window_bounds = array<i64: 1, 32>}, {transform_indices = @transform_12, window_bounds = array<i64: 16, 32>}]} {
    %c0 = arith.constant 0 : index
    %c0_0 = arith.constant 0 : index
    %0 = vector.load %arg1[%c0, %c0_0] : memref<16x32xbf16, #tpu.memory_space<vmem>>, vector<16x32xbf16>
    %c0_1 = arith.constant 0 : index
    %c0_2 = arith.constant 0 : index
    %1 = vector.load %arg3[%c0_1, %c0_2] : memref<32x32xbf16, #tpu.memory_space<vmem>>, vector<32x32xbf16>
    %cst = arith.constant dense<0.000000e+00> : vector<16x32xf32>
    %2 = tpu.matmul %0, %1, %cst {dimension_numbers = #tpu.dot_dimension_numbers<[1], [0], [0], [1], [0, 0, 1, 1], [], []>} : vector<16x32xbf16>, vector<32x32xbf16>, vector<16x32xf32> -> vector<16x32xf32>
    %c0_3 = arith.constant 0 : index
    %c0_4 = arith.constant 0 : index
    %3 = vector.load %arg4[%c0_3, %c0_4] : memref<1x32xf32, #tpu.memory_space<vmem>>, vector<1x32xf32>
    %4 = vector.broadcast %3 : vector<1x32xf32> to vector<16x32xf32>
    %5 = arith.addf %2, %4 : vector<16x32xf32>
    %c0_5 = arith.constant 0 : index
    %c0_6 = arith.constant 0 : index
    %6 = vector.load %arg2[%c0_5, %c0_6] : memref<16x32xf32, #tpu.memory_space<vmem>>, vector<16x32xf32>
    %7 = arith.addf %6, %5 : vector<16x32xf32>
    %c0_7 = arith.constant 0 : index
    %c0_8 = arith.constant 0 : index
    %8 = vector.load %arg5[%c0_7, %c0_8] : memref<1x32xf32, #tpu.memory_space<vmem>>, vector<1x32xf32>
    %c0_9 = arith.constant 0 : index
    %c0_10 = arith.constant 0 : index
    %9 = vector.load %arg6[%c0_9, %c0_10] : memref<1x32xf32, #tpu.memory_space<vmem>>, vector<1x32xf32>
    %cst_11 = arith.constant dense<0.000000e+00> : vector<16xf32>
    %10 = vector.multi_reduction <add>, %7, %cst_11 [1] : vector<16x32xf32> to vector<16xf32>
    %11 = vector.shape_cast %10 : vector<16xf32> to vector<16x1xf32>
    %cst_12 = arith.constant 3.200000e+01 : f32
    %12 = vector.broadcast %cst_12 : f32 to vector<16x1xf32>
    %13 = arith.divf %11, %12 : vector<16x1xf32>
    %14 = vector.broadcast %13 : vector<16x1xf32> to vector<16x32xf32>
    %15 = arith.subf %7, %14 : vector<16x32xf32>
    %16 = arith.mulf %15, %15 : vector<16x32xf32>
    %cst_13 = arith.constant dense<0.000000e+00> : vector<16xf32>
    %17 = vector.multi_reduction <add>, %16, %cst_13 [1] : vector<16x32xf32> to vector<16xf32>
    %18 = vector.shape_cast %17 : vector<16xf32> to vector<16x1xf32>
    %cst_14 = arith.constant 3.200000e+01 : f32
    %19 = vector.broadcast %cst_14 : f32 to vector<16x1xf32>
    %20 = arith.divf %18, %19 : vector<16x1xf32>
    %21 = vector.broadcast %13 : vector<16x1xf32> to vector<16x32xf32>
    %22 = arith.subf %7, %21 : vector<16x32xf32>
    %cst_15 = arith.constant 9.99999974E-6 : f32
    %23 = vector.broadcast %cst_15 : f32 to vector<16x1xf32>
    %24 = arith.addf %20, %23 : vector<16x1xf32>
    %25 = math.rsqrt %24 : vector<16x1xf32>
    %26 = vector.broadcast %25 : vector<16x1xf32> to vector<16x32xf32>
    %27 = arith.mulf %22, %26 : vector<16x32xf32>
    %28 = vector.broadcast %8 : vector<1x32xf32> to vector<16x32xf32>
    %29 = arith.mulf %27, %28 : vector<16x32xf32>
    %30 = vector.broadcast %9 : vector<1x32xf32> to vector<16x32xf32>
    %31 = arith.addf %29, %30 : vector<16x32xf32>
    %32 = arith.truncf %31 : vector<16x32xf32> to vector<16x32xbf16>
    %c0_16 = arith.constant 0 : index
    %c0_17 = arith.constant 0 : index
    %33 = vector.load %arg7[%c0_16, %c0_17] : memref<32x64xbf16, #tpu.memory_space<vmem>>, vector<32x64xbf16>
    %cst_18 = arith.constant dense<0.000000e+00> : vector<16x64xf32>
    %34 = tpu.matmul %32, %33, %cst_18 {dimension_numbers = #tpu.dot_dimension_numbers<[1], [0], [0], [1], [0, 0, 1, 1], [], []>} : vector<16x32xbf16>, vector<32x64xbf16>, vector<16x64xf32> -> vector<16x64xf32>
    %c0_19 = arith.constant 0 : index
    %c0_20 = arith.constant 0 : index
    %35 = vector.load %arg8[%c0_19, %c0_20] : memref<1x64xf32, #tpu.memory_space<vmem>>, vector<1x64xf32>
    %36 = vector.broadcast %35 : vector<1x64xf32> to vector<16x64xf32>
    %37 = arith.addf %34, %36 : vector<16x64xf32>
    %cst_21 = arith.constant 0.000000e+00 : f32
    %38 = vector.broadcast %cst_21 : f32 to vector<16x64xf32>
    %39 = arith.maximumf %37, %38 : vector<16x64xf32>
    %40 = arith.truncf %39 : vector<16x64xf32> to vector<16x64xbf16>
    %c0_22 = arith.constant 0 : index
    %c0_23 = arith.constant 0 : index
    %41 = vector.load %arg9[%c0_22, %c0_23] : memref<64x32xbf16, #tpu.memory_space<vmem>>, vector<64x32xbf16>
    %cst_24 = arith.constant dense<0.000000e+00> : vector<16x32xf32>
    %42 = tpu.matmul %40, %41, %cst_24 {dimension_numbers = #tpu.dot_dimension_numbers<[1], [0], [0], [1], [0, 0, 1, 1], [], []>} : vector<16x64xbf16>, vector<64x32xbf16>, vector<16x32xf32> -> vector<16x32xf32>
    %c0_25 = arith.constant 0 : index
    %c0_26 = arith.constant 0 : index
    %43 = vector.load %arg10[%c0_25, %c0_26] : memref<1x32xf32, #tpu.memory_space<vmem>>, vector<1x32xf32>
    %44 = vector.broadcast %43 : vector<1x32xf32> to vector<16x32xf32>
    %45 = arith.addf %42, %44 : vector<16x32xf32>
    %46 = arith.addf %31, %45 : vector<16x32xf32>
    %c0_27 = arith.constant 0 : index
    %c0_28 = arith.constant 0 : index
    %47 = vector.load %arg11[%c0_27, %c0_28] : memref<1x32xf32, #tpu.memory_space<vmem>>, vector<1x32xf32>
    %c0_29 = arith.constant 0 : index
    %c0_30 = arith.constant 0 : index
    %48 = vector.load %arg12[%c0_29, %c0_30] : memref<1x32xf32, #tpu.memory_space<vmem>>, vector<1x32xf32>
    %cst_31 = arith.constant dense<0.000000e+00> : vector<16xf32>
    %49 = vector.multi_reduction <add>, %46, %cst_31 [1] : vector<16x32xf32> to vector<16xf32>
    %50 = vector.shape_cast %49 : vector<16xf32> to vector<16x1xf32>
    %cst_32 = arith.constant 3.200000e+01 : f32
    %51 = vector.broadcast %cst_32 : f32 to vector<16x1xf32>
    %52 = arith.divf %50, %51 : vector<16x1xf32>
    %53 = vector.broadcast %52 : vector<16x1xf32> to vector<16x32xf32>
    %54 = arith.subf %46, %53 : vector<16x32xf32>
    %55 = arith.mulf %54, %54 : vector<16x32xf32>
    %cst_33 = arith.constant dense<0.000000e+00> : vector<16xf32>
    %56 = vector.multi_reduction <add>, %55, %cst_33 [1] : vector<16x32xf32> to vector<16xf32>
    %57 = vector.shape_cast %56 : vector<16xf32> to vector<16x1xf32>
    %cst_34 = arith.constant 3.200000e+01 : f32
    %58 = vector.broadcast %cst_34 : f32 to vector<16x1xf32>
    %59 = arith.divf %57, %58 : vector<16x1xf32>
    %60 = vector.broadcast %52 : vector<16x1xf32> to vector<16x32xf32>
    %61 = arith.subf %46, %60 : vector<16x32xf32>
    %cst_35 = arith.constant 9.99999974E-6 : f32
    %62 = vector.broadcast %cst_35 : f32 to vector<16x1xf32>
    %63 = arith.addf %59, %62 : vector<16x1xf32>
    %64 = math.rsqrt %63 : vector<16x1xf32>
    %65 = vector.broadcast %64 : vector<16x1xf32> to vector<16x32xf32>
    %66 = arith.mulf %61, %65 : vector<16x32xf32>
    %67 = vector.broadcast %47 : vector<1x32xf32> to vector<16x32xf32>
    %68 = arith.mulf %66, %67 : vector<16x32xf32>
    %69 = vector.broadcast %48 : vector<1x32xf32> to vector<16x32xf32>
    %70 = arith.addf %68, %69 : vector<16x32xf32>
    %c0_36 = arith.constant 0 : index
    %c0_37 = arith.constant 0 : index
    %71 = vector.load %arg13[%c0_36, %c0_37] : memref<16x32xf32, #tpu.memory_space<vmem>>, vector<16x32xf32>
    tpu.vector_store %arg13[%c0_36, %c0_37], %70 {strides = array<i32>} : memref<16x32xf32, #tpu.memory_space<vmem>>, vector<16x32xf32>,
    return
  }
  func.func @transform_0(%arg0: i32) -> (i32, i32) {
    %c0_i32 = arith.constant 0 : i32
    %c0_i32_0 = arith.constant 0 : i32
    return %arg0, %c0_i32 : i32, i32
  }
  func.func @transform_1(%arg0: i32) -> (i32, i32) {
    %c0_i32 = arith.constant 0 : i32
    %c0_i32_0 = arith.constant 0 : i32
    return %arg0, %c0_i32 : i32, i32
  }
  func.func @transform_2(%arg0: i32) -> (i32, i32) {
    %c0_i32 = arith.constant 0 : i32
    %c0_i32_0 = arith.constant 0 : i32
    %c0_i32_1 = arith.constant 0 : i32
    return %c0_i32, %c0_i32_0 : i32, i32
  }
  func.func @transform_3(%arg0: i32) -> (i32, i32) {
    %c0_i32 = arith.constant 0 : i32
    %c0_i32_0 = arith.constant 0 : i32
    %c0_i32_1 = arith.constant 0 : i32
    return %c0_i32, %c0_i32_0 : i32, i32
  }
  func.func @transform_4(%arg0: i32) -> (i32, i32) {
    %c0_i32 = arith.constant 0 : i32
    %c0_i32_0 = arith.constant 0 : i32
    %c0_i32_1 = arith.constant 0 : i32
    return %c0_i32, %c0_i32_0 : i32, i32
  }
  func.func @transform_5(%arg0: i32) -> (i32, i32) {
    %c0_i32 = arith.constant 0 : i32
    %c0_i32_0 = arith.constant 0 : i32
    %c0_i32_1 = arith.constant 0 : i32
    return %c0_i32, %c0_i32_0 : i32, i32
  }
  func.func @transform_6(%arg0: i32) -> (i32, i32) {
    %c0_i32 = arith.constant 0 : i32
    %c0_i32_0 = arith.constant 0 : i32
    %c0_i32_1 = arith.constant 0 : i32
    return %c0_i32, %c0_i32_0 : i32, i32
  }
  func.func @transform_7(%arg0: i32) -> (i32, i32) {
    %c0_i32 = arith.constant 0 : i32
    %c0_i32_0 = arith.constant 0 : i32
    %c0_i32_1 = arith.constant 0 : i32
    return %c0_i32, %c0_i32_0 : i32, i32
  }
  func.func @transform_8(%arg0: i32) -> (i32, i32) {
    %c0_i32 = arith.constant 0 : i32
    %c0_i32_0 = arith.constant 0 : i32
    %c0_i32_1 = arith.constant 0 : i32
    return %c0_i32, %c0_i32_0 : i32, i32
  }
  func.func @transform_9(%arg0: i32) -> (i32, i32) {
    %c0_i32 = arith.constant 0 : i32
    %c0_i32_0 = arith.constant 0 : i32
    %c0_i32_1 = arith.constant 0 : i32
    return %c0_i32, %c0_i32_0 : i32, i32
  }
  func.func @transform_10(%arg0: i32) -> (i32, i32) {
    %c0_i32 = arith.constant 0 : i32
    %c0_i32_0 = arith.constant 0 : i32
    %c0_i32_1 = arith.constant 0 : i32
    return %c0_i32, %c0_i32_0 : i32, i32
  }
  func.func @transform_11(%arg0: i32) -> (i32, i32) {
    %c0_i32 = arith.constant 0 : i32
    %c0_i32_0 = arith.constant 0 : i32
    %c0_i32_1 = arith.constant 0 : i32
    return %c0_i32, %c0_i32_0 : i32, i32
  }
  func.func @transform_12(%arg0: i32) -> (i32, i32) {
    %c0_i32 = arith.constant 0 : i32
    %c0_i32_0 = arith.constant 0 : i32
    return %arg0, %c0_i32 : i32, i32
  }
}

</mosaic_0001>

<bundles_post_ra>
// kernel: transformer_encoder_layer.3
= control target key start
LH: loop header
LB: loop body
LE: loop exit
PB: predicated region body
PF: predicated region fallthrough
CT: control target
= control target key end

     0   :  { %v450_v0 = vmov 0.0   ;;  %vm451_vm0 = vmmov 0   ;;  %vm72_vm1 = vcmask 261120   ;;  %vm276_vm2 = vcmask 523264   ;;  %s600_s2 = inlined_call_operand.vmem [shape: bf16[32,32], index: 2, kind: input, shape index: {}]   ;;  %s601_s0 = inlined_call_operand.vmem [shape: bf16[16,32], index: 0, kind: input, shape index: {}]   ;;  %s602_s3 = inlined_call_operand.vmem [shape: f32[1,32], index: 3, kind: input, shape index: {}]   ;;  %s603_s1 = inlined_call_operand.vmem [shape: f32[16,32], index: 1, kind: input, shape index: {}]   ;;  %s604_s6 = inlined_call_operand.vmem [shape: bf16[32,64], index: 6, kind: input, shape index: {}]   ;;  %s605_s8 = inlined_call_operand.vmem [shape: bf16[64,32], index: 8, kind: input, shape index: {}]   ;;  %s606_s4 = inlined_call_operand.vmem [shape: f32[1,32], index: 4, kind: input, shape index: {}]   ;;  %s607_s5 = inlined_call_operand.vmem [shape: f32[1,32], index: 5, kind: input, shape index: {}]   ;;  %s608_s7 = inlined_call_operand.vmem [shape: f32[1,64], index: 7, kind: input, shape index: {}]   ;;  %s609_s9 = inlined_call_operand.vmem [shape: f32[1,32], index: 9, kind: input, shape index: {}]   ;;  %s610_s10 = inlined_call_operand.vmem [shape: f32[1,32], index: 10, kind: input, shape index: {}]   ;;  %s611_s11 = inlined_call_operand.vmem [shape: f32[1,32], index: 11, kind: input, shape index: {}]   ;;  %s612_s12 = inlined_call_operand.vmem [shape: f32[16,32], index: 12, kind: output, shape index: {}]  }
   0x1   :  { %403 = vmatprep.subr.bf16.mxu1 %v450_v0  ;;  %v433_v1 = vld [vmem:[%s600_s2 + $0x8] sm:$0xff]   ;;  %407 = vmatprep.mubr.msk.bf16.mxu1 %vm451_vm0, %v450_v0  ;;  %v434_v2 = vld [vmem:[%s600_s2] sm:$0xff]   ;;  %v438_v29 = vld [vmem:[%s605_s8 + $0x18] sm:$0xff]  }
   0x2   :  { %419 = vmatprep.subr.bf16.mxu0 %v450_v0  ;;  %427 = vmatprep.mubr.msk.bf16.mxu0 %vm451_vm0, %v450_v0  ;;  %v435_v3 = vld [vmem:[%s601_s0] sm:$0xff]   ;;  %v118_v11 = vld [vmem:[%s603_s1 + $0x8] sm:$0xff]  ;;  %v439_v47 = vld [vmem:[%s605_s8 + $0x10] sm:$0xff]  }
   0x3   :  { %404 = vmatpush3.bf16.msra.mxu1 %v433_v1  ;;  %v373_v4 = vld [vmem:[%s602_s3] ss:$0 sm:$0xff]  ;;  %v436_v27 = vld [vmem:[%s604_s6 + $0x8] sm:$0xff]   ;;  %420 = vmatpush3.bf16.msra.mxu0 %v438_v29 }
   0x4   :  { %405 = vmatprep.subr.bf16.mxu1 %v450_v0  ;;  %v117_v6 = vld [vmem:[%s603_s1] sm:$0xff]  ;;  %421 = vmatprep.subr.bf16.mxu0 %v450_v0  ;;  %v440_v48 = vld [vmem:[%s605_s8 + $0x8] sm:$0xff]  }
   0x5   :  { %v437_v28 = vld [vmem:[%s604_s6] sm:$0xff]  }
   0x6   :  { %v378_v38 = vld [vmem:[%s606_s4] ss:$0 sm:$0xff] }
   0x7   :  { %406 = vmatpush3.bf16.msra.mxu1 %v434_v2  ;;  %v379_v42 = vld [vmem:[%s607_s5] ss:$0 sm:$0xff]  ;;  %422 = vmatpush3.bf16.msra.mxu0 %v439_v47 }
   0x8   :  { %411 = vmatprep.subr.bf16.mxu1 %v450_v0  ;;  %423 = vmatprep.subr.bf16.mxu0 %v450_v0  ;;  %v441_v49 = vld [vmem:[%s605_s8] sm:$0xff]  }
   0x9   :  { %v380_v50 = vld [vmem:[%s608_s7] ss:$0 sm:$0xff] }
   0xa   :  { %408 = vmatmul.mubr.msk.bf16.vlgmr.msra.gmra.mxu1 %vm72_vm1, %v435_v3  ;;  %v384_v60 = vld [vmem:[%s609_s9] ss:$0 sm:$0xff] }
   0xb   :  { %415 = vmatprep.mubr.msk.bf16.mxu1 %vm451_vm0, %v450_v0  ;;  %412 = vmatpush3.bf16.msra.mxu1 %v436_v27 }
   0xc   :  { %413 = vmatprep.subr.bf16.mxu1 %v450_v0  ;;  %424 = vmatpush3.bf16.msra.mxu0 %v440_v48 }
   0xd   :  { %425 = vmatprep.subr.bf16.mxu0 %v450_v0 }
   0xf   :  { %414 = vmatpush3.bf16.msra.mxu1 %v437_v28 }
  0x10   :  { %426 = vmatpush3.bf16.msra.mxu0 %v441_v49 }
  0xca   :  { %v110_v5 = vpop.f32.mrf.mxu1 }
  0xcb   :  { %v111_v7 = vadd.f32 %v373_v4, %v110_v5 }
  0xcc   :  { %v409_v8 = vpop.f32.mrf.mxu1 }
  0xcd   :  { %v119_v9 = vadd.f32 %v117_v6, %v111_v7 }
  0xce   :  { %v113_v10 = vpop.f32.mrf.mxu1 }
  0xcf   :  { %v114_v12 = vadd.f32 %v373_v4, %v113_v10  ;;  %v123_v13 = vsel %vm72_vm1, %v119_v9, 0.0 }
  0xd0   :  { %124 = vadd.xlane.f32.xlu0 %v123_v13  ;;  %v410_v14 = vpop.f32.mrf.mxu1 }
  0xd1   :  { %v120_v15 = vadd.f32 %v118_v11, %v114_v12 }
  0xd3   :  { %v126_v16 = vsel %vm72_vm1, %v120_v15, 0.0 }
  0xd4   :  { %127 = vadd.xlane.f32.xlu0 %v126_v16 }
 0x159   :  { %v125_v17 = vpop.xlane.xlu0 %124 }
 0x15a   :  { %v130_v18 = vmul.f32 0.03125, %v125_v17 }
 0x15c   :  { %v132_v19 = vsub.f32 %v119_v9, %v130_v18 }
 0x15d   :  { %v128_v20 = vpop.xlane.xlu0 %127 }
 0x15e   :  { %v131_v21 = vmul.f32 0.03125, %v128_v20  ;;  %v134_v22 = vmul.f32 %v132_v19, %v132_v19 }
 0x160   :  { %v133_v23 = vsub.f32 %v120_v15, %v131_v21  ;;  %v136_v24 = vsel %vm72_vm1, %v134_v22, 0.0 }
 0x161   :  { %137 = vadd.xlane.f32.xlu1 %v136_v24  ;;  %v390_v24 = vld [vmem:[%s610_s10] ss:$0 sm:$0xff] }
 0x162   :  { %v135_v25 = vmul.f32 %v133_v23, %v133_v23 }
 0x164   :  { %v139_v26 = vsel %vm72_vm1, %v135_v25, 0.0 }
 0x165   :  { %140 = vadd.xlane.f32.xlu1 %v139_v26  ;;  %v391_v26 = vld [vmem:[%s611_s11] ss:$0 sm:$0xff] }
 0x1ea   :  { %v138_v30 = vpop.xlane.xlu1 %137 }
 0x1eb   :  { %v142_v31 = vmul.f32 0.03125, %v138_v30 }
 0x1ed   :  { %v144_v32 = vadd.f32 1e-05, %v142_v31 }
 0x1ee   :  { %v141_v33 = vpop.xlane.xlu1 %140 }
 0x1ef   :  { %442 = vrsqrt.f32 %v144_v32  ;;  %v143_v34 = vmul.f32 0.03125, %v141_v33 }
 0x1f1   :  { %v145_v35 = vadd.f32 1e-05, %v143_v34 }
 0x1f3   :  { %444 = vrsqrt.f32 %v145_v35 }
 0x1fc   :  { %v443_v36 = vpop.eup %442 }
 0x1fd   :  { %v148_v37 = vmul.f32 %v443_v36, %v132_v19 }
 0x1ff   :  { %v156_v41 = vmul.f32 %v378_v38, %v148_v37 }
 0x200   :  { %v445_v39 = vpop.eup %444 }
 0x201   :  { %v149_v40 = vmul.f32 %v445_v39, %v133_v23  ;;  %v164_v44 = vadd.f32 %v379_v42, %v156_v41 }
 0x203   :  { %v157_v43 = vmul.f32 %v378_v38, %v149_v40 }
 0x205   :  { %v165_v45 = vadd.f32 %v379_v42, %v157_v43 }
 0x207   :  { %v166_v46 = vpack.c.bf16 %v165_v45, %v164_v44 }
 0x209   :  { %416 = vmatmul.mubr.msk.bf16.vlgmr.msra.gmra.mxu1 %vm72_vm1, %v166_v46 }
 0x2c9   :  { %v227_v51 = vpop.f32.mrf.mxu1 }
 0x2ca   :  { %v228_v53 = vadd.f32 %v380_v50, %v227_v51 }
 0x2cb   :  { %v417_v52 = vpop.f32.mrf.mxu1 }
 0x2cc   :  { %v234_v57 = vmax.f32 %v228_v53, 0.0 }
 0x2cd   :  { %v230_v54 = vpop.f32.mrf.mxu1 }
 0x2ce   :  { %v231_v55 = vadd.f32 %v380_v50, %v230_v54 }
 0x2cf   :  { %v418_v56 = vpop.f32.mrf.mxu1 }
 0x2d0   :  { %v235_v58 = vmax.f32 %v231_v55, 0.0 }
 0x2d2   :  { %v236_v59 = vpack.c.bf16 %v235_v58, %v234_v57 }
 0x2d4   :  { %428 = vmatmul.mubr.msk.bf16.vlgmr.msra.gmra.mxu0 %vm276_vm2, %v236_v59 }
 0x394   :  { %v314_v61 = vpop.f32.mrf.mxu0 }
 0x395   :  { %v315_v62 = vadd.f32 %v384_v60, %v314_v61 }
 0x396   :  { %v429_v63 = vpop.f32.mrf.mxu0 }
 0x397   :  { %v321_v0 = vadd.f32 %v315_v62, %v164_v44 }
 0x398   :  { %v317_v1 = vpop.f32.mrf.mxu0 }
 0x399   :  { %v318_v2 = vadd.f32 %v384_v60, %v317_v1  ;;  %v325_v3 = vsel %vm72_vm1, %v321_v0, 0.0 }
 0x39a   :  { %326 = vadd.xlane.f32.xlu0 %v325_v3  ;;  %v430_v4 = vpop.f32.mrf.mxu0 }
 0x39b   :  { %v322_v5 = vadd.f32 %v318_v2, %v165_v45 }
 0x39d   :  { %v328_v6 = vsel %vm72_vm1, %v322_v5, 0.0 }
 0x39e   :  { %329 = vadd.xlane.f32.xlu1 %v328_v6 }
 0x423   :  { %v327_v7 = vpop.xlane.xlu0 %326 }
 0x424   :  { %v331_v8 = vmul.f32 0.03125, %v327_v7 }
 0x426   :  { %v333_v9 = vsub.f32 %v321_v0, %v331_v8 }
 0x427   :  { %v330_v10 = vpop.xlane.xlu1 %329 }
 0x428   :  { %v332_v11 = vmul.f32 0.03125, %v330_v10  ;;  %v335_v12 = vmul.f32 %v333_v9, %v333_v9 }
 0x42a   :  { %v334_v13 = vsub.f32 %v322_v5, %v332_v11  ;;  %v337_v14 = vsel %vm72_vm1, %v335_v12, 0.0 }
 0x42b   :  { %338 = vadd.xlane.f32.xlu0 %v337_v14 }
 0x42c   :  { %v336_v15 = vmul.f32 %v334_v13, %v334_v13 }
 0x42e   :  { %v340_v16 = vsel %vm72_vm1, %v336_v15, 0.0 }
 0x42f   :  { %341 = vadd.xlane.f32.xlu1 %v340_v16 }
 0x4b4   :  { %v339_v17 = vpop.xlane.xlu0 %338 }
 0x4b5   :  { %v343_v18 = vmul.f32 0.03125, %v339_v17 }
 0x4b7   :  { %v345_v19 = vadd.f32 1e-05, %v343_v18 }
 0x4b8   :  { %v342_v20 = vpop.xlane.xlu1 %341 }
 0x4b9   :  { %446 = vrsqrt.f32 %v345_v19  ;;  %v344_v21 = vmul.f32 0.03125, %v342_v20 }
 0x4bb   :  { %v346_v22 = vadd.f32 1e-05, %v344_v21 }
 0x4bd   :  { %448 = vrsqrt.f32 %v346_v22 }
 0x4c6   :  { %v447_v23 = vpop.eup %446 }
 0x4c7   :  { %v349_v25 = vmul.f32 %v447_v23, %v333_v9 }
 0x4c9   :  { %v357_v27 = vmul.f32 %v390_v24, %v349_v25 }
 0x4ca   :  { %v449_v28 = vpop.eup %448 }
 0x4cb   :  { %v365_v29 = vadd.f32 %v391_v26, %v357_v27  ;;  %v350_v30 = vmul.f32 %v449_v28, %v334_v13 }
 0x4cd   :  { %367 = vst.msk [vmem:[%s612_s12] sm:$0xff] %vm72_vm1, %v365_v29  ;;  %v358_v31 = vmul.f32 %v390_v24, %v350_v30 }
 0x4cf   :  { %v366_v32 = vadd.f32 %v391_v26, %v358_v31 }
 0x4d1   :  { %368 = vst.msk [vmem:[%s612_s12 + $0x8] sm:$0xff] %vm72_vm1, %v366_v32 }

// kernel: transformer_encoder_layer.2
= control target key start
LH: loop header
LB: loop body
LE: loop exit
PB: predicated region body
PF: predicated region fallthrough
CT: control target
= control target key end

     0   :  { %s1331_s24 = smov 0   ;;  %s1333_s25 = smov 0   ;;  %s1482_s0 = inlined_call_operand.vmem [shape: bf16[16,32], index: 0, kind: input, shape index: {}, may-alias: {0,1}]   ;;  %s1483_s1 = inlined_call_operand.vmem [shape: bf16[16,32], index: 1, kind: input, shape index: {}, may-alias: {0,1}]   ;;  %s1484_s2 = inlined_call_operand.vmem [shape: bf16[32,32], index: 2, kind: input, shape index: {}]   ;;  %s1485_s3 = inlined_call_operand.vmem [shape: f32[1,32], index: 3, kind: input, shape index: {}]   ;;  %s1486_s4 = inlined_call_operand.vmem [shape: bf16[32,64], index: 4, kind: input, shape index: {}]   ;;  %s1487_s5 = inlined_call_operand.vmem [shape: f32[1,64], index: 5, kind: input, shape index: {}]   ;;  %s1488_s6 = inlined_call_operand.vmem [shape: f32[2,8,8], index: 6, kind: input, shape index: {}]   ;;  %s1489_s7 = inlined_call_operand.vmem [shape: bf16[16,32], index: 7, kind: output, shape index: {}]  }
   0x1   :  { %s1335_s26 = smov 0  }
   0x2 LB: > { %s29_s27 = sadd.s32 1, %s1276_s25  ;;  %p1088_p0 = scmp.ge.s32.totalorder %s1280_s26, 1  ;;  %s1280_s26 = sphi %s1335_s26, %s17_s26   ;;  %s1276_s25 = sphi %s1333_s25, %s1491_s25   ;;  %s1272_s24 = sphi %s1331_s24, %s1490_s24  }
   0x3   : > { %p31_p1 = scmp.ge.s32.totalorder %s29_s27, 2  ;;  %p277_p2 = scmp.lt.s32.totalorder %s1280_s26, 3 }
   0x5   : > { %s1493_s27 = smov (%p31_p1, %s29_s27), 0  ;;  %p278_p3 = pnand %p1088_p0, %p277_p2 }
   0x6   : > { %p321_p4 = scmp.lt.s32.totalorder (!%p278_p3), %s1272_s24, 1  ;;  %s1284_s28 = smov (!%p278_p3), 104  }
   0x7   : > { %281 = sbr.rel (%p278_p3) target bundleno = 1184 (0x4a0), region = 48  ;;  %s1285_s29 = smov (!%p278_p3), 120  }
   0x8   : > { %s1286_s30 = smov (!%p278_p3), 112   ;;  %s1288_s12 = smov (!%p278_p3), 16  }
   0x9   : > { %s1289_s14 = smov (!%p278_p3), 8   ;;  %s1290_s15 = smov (!%p278_p3), 24  }
   0xc   : > { %v1238_v0 = vld [vmem:[%s1486_s4 + $0x8] sm:$0xff]   ;;  %v1282_v1 = vmov 0.0   ;;  %v1239_v2 = vld [vmem:[%s1486_s4] sm:$0xff]   ;;  %vm1283_vm0 = vmmov 0   ;;  %s1495_s24 = smov (!%p321_p4, %s1272_s24), 1  ;;  %vm372_vm1 = vcmask 261120  }
   0xd   : > { %1141 = vmatprep.subr.bf16.mxu0 %v1282_v1  ;;  %1149 = vmatprep.subr.bf16.mxu1 %v1282_v1  ;;  %v1240_v3 = vld [vmem:[%s1484_s2 + $0x8] sm:$0xff]   ;;  %v1241_v4 = vld [vmem:[%s1484_s2] sm:$0xff]   ;;  %s1371_s13 = sshll.u32 %s1495_s24, 2  ;;  %vm430_vm2 = vcmask 60416   ;;  %vm550_vm3 = vcmask 64512   ;;  %s1091_s8 = sshll.u32 %s1495_s24, 3 }
   0xe   : > { %1142 = vmatpush3.bf16.msra.mxu0 %v1238_v0  ;;  %1145 = vmatprep.mubr.msk.bf16.mxu0 %vm1283_vm0, %v1282_v1  ;;  %s329_s16 = scalar_lea.vmem %s1483_s1, %s1371_s13  ;;  %s324_s19 = scalar_lea.vmem %s1482_s0, %s1371_s13  ;;  %v1093_v7 = vld [vmem:[%s1487_s5] ss:$0 sm:$0xff]  ;;  %vm790_vm4 = vcmask 1043456   ;;  %vm985_vm5 = vcmask 130048   ;;  %vm987_vm6 = vcmask 195584   ;;  %vm990_vm7 = vcmask 257024  }
   0xf   : > { %1143 = vmatprep.subr.bf16.mxu0 %v1282_v1  ;;  %1153 = vmatprep.mubr.msk.bf16.mxu1 %vm1283_vm0, %v1282_v1  ;;  %v348_v5 = vld [vmem:[%s329_s16] sm:$0xf]  ;;  %s336_s11 = scalar_lea.vmem %s1488_s6, %s1091_s8  ;;  %s1287_s24 = smov 96  }
  0x10   : > { %1150 = vmatpush3.bf16.msra.mxu1 %v1240_v3  ;;  %v463_v6 = vld [vmem:[%s324_s19] sm:$0xf]  ;;  %s341_s18 = scalar_lea.vmem %s1489_s7, %s1371_s13 }
  0x11   : > { %1151 = vmatprep.subr.bf16.mxu1 %v1282_v1  ;;  %v1101_v10 = vld [vmem:[%s1485_s3] ss:$0 sm:$0xff] }
  0x12   : > { %1144 = vmatpush3.bf16.msra.mxu0 %v1239_v2  ;;  %v549_v41 = vld [vmem:[%s336_s11] sm:$0xff] }
  0x13   : > { %1157 = vmatprep.subr.bf16.mxu0 %v1282_v1 }
  0x14   : > { %1152 = vmatpush3.bf16.msra.mxu1 %v1241_v4 }
  0x15   : > { %1146 = vmatmul.mubr.msk.bf16.vlgmr.msra.gmra.mxu0 %vm372_vm1, %v348_v5  ;;  %1163 = vmatprep.subr.bf16.mxu1 %v1282_v1 }
  0x16   : > { %1159 = vmatprep.mubr.msk.bf16.mxu0 %vm1283_vm0, %v1282_v1 }
  0x17   : > { %1154 = vmatmul.mubr.msk.bf16.vlgmr.msra.gmra.mxu1 %vm372_vm1, %v463_v6 }
  0x18   : > { %1165 = vmatprep.mubr.msk.bf16.mxu1 %vm1283_vm0, %v1282_v1 }
  0xd5   : > { %v410_v8 = vpop.f32.mrf.mxu0 }
  0xd6   : > { %v411_v9 = vadd.f32 %v1093_v7, %v410_v8 }
  0xd7   : > { %v1147_v11 = vpop.f32.mrf.mxu0  ;;  %v525_v13 = vpop.f32.mrf.mxu1 }
  0xd8   : > { %v1394_v12 = vpack.c.bf16 %v411_v9, %v411_v9  ;;  %423 = vrot.lane.b32.xlu1 %v411_v9, %s1284_s28  ;;  %417 = vrot.lane.b32.xlu0 %v411_v9, %s1285_s29  ;;  %v526_v15 = vadd.f32 %v1101_v10, %v525_v13 }
  0xd9   : > { %v413_v14 = vpop.f32.mrf.mxu0  ;;  %v1155_v16 = vpop.f32.mrf.mxu1 }
  0xda   : > { %431 = vst.msk [vmem:[#allocation2] sm:$0xf] %vm430_vm2, %v1394_v12  ;;  %v541_v22 = vpack.c.bf16 %v526_v15, %v526_v15 }
  0xdb   : > { %v1148_v17 = vpop.f32.mrf.mxu0  ;;  %v528_v18 = vpop.f32.mrf.mxu1 }
  0xdc   : > { %420 = vrot.lane.b32.xlu0 %v411_v9, %s1286_s30  ;;  %532 = vrot.lane.b32.xlu1 %v526_v15, %s1285_s29 }
  0xdd   : > { %v1156_v19 = vpop.f32.mrf.mxu1 }
  0xe0   : > { %535 = vrot.lane.b32.xlu0 %v526_v15, %s1286_s30  ;;  %538 = vrot.lane.b32.xlu1 %v526_v15, %s1284_s28 }
  0xe1   : > { %v545_v20 = vld [vmem:[#allocation2] sm:$0xf] }
  0xe2   : > { %v555_v21 = vsel %vm550_vm3, %v545_v20, 0 }
  0xe3   : > { %1158 = vmatpush3.bf16.xpose.msra.mxu0 %v555_v21 }
  0xe4   : > { %1169 = vmatprep.subr.bf16.mxu0 %v1282_v1 }
  0xea   : > { %1160 = vmatmul.mubr.msk.bf16.vlgmr.msra.gmra.mxu0 %vm550_vm3, %v541_v22 }
  0xeb   : > { %1171 = vmatprep.mubr.msk.bf16.mxu0 %vm1283_vm0, %v1282_v1 }
 0x14a   : > { %v424_v23 = vpop.permute.xlu1 %423  ;;  %v418_v24 = vpop.permute.xlu0 %417 }
 0x14b   : > { %v1403_v25 = vpack.c.bf16 %v424_v23, %v424_v23  ;;  %v1405_v26 = vpack.c.bf16 %v418_v24, %v418_v24 }
 0x14d   : > { %434 = vst.msk [vmem:[#allocation2 + $0xc] sm:$0xf] %vm430_vm2, %v1403_v25  ;;  %432 = vst.msk [vmem:[#allocation2 + $0x4] sm:$0xf] %vm430_vm2, %v1405_v26 }
 0x14e   : > { %v421_v27 = vpop.permute.xlu0 %420  ;;  %v533_v31 = vpop.permute.xlu1 %532 }
 0x14f   : > { %v1411_v28 = vpack.c.bf16 %v421_v27, %v421_v27  ;;  %v542_v33 = vpack.c.bf16 %v533_v31, %v533_v31 }
 0x151   : > { %433 = vst.msk [vmem:[#allocation2 + $0x8] sm:$0xf] %vm430_vm2, %v1411_v28 }
 0x152   : > { %v536_v36 = vpop.permute.xlu0 %535  ;;  %v539_v39 = vpop.permute.xlu1 %538 }
 0x153   : > { %v543_v38 = vpack.c.bf16 %v536_v36, %v536_v36  ;;  %v544_v40 = vpack.c.bf16 %v539_v39, %v539_v39 }
 0x154   : > { %v546_v29 = vld [vmem:[#allocation2 + $0x4] sm:$0xf]  ;;  %v548_v35 = vld [vmem:[#allocation2 + $0xc] sm:$0xf] }
 0x155   : > { %v601_v30 = vsel %vm550_vm3, %v546_v29, 0  ;;  %v693_v37 = vsel %vm550_vm3, %v548_v35, 0 }
 0x156   : > { %1164 = vmatpush3.bf16.xpose.msra.mxu1 %v601_v30 }
 0x157   : > { %1175 = vmatprep.subr.bf16.mxu1 %v1282_v1 }
 0x158   : > { %v547_v32 = vld [vmem:[#allocation2 + $0x8] sm:$0xf] }
 0x159   : > { %v647_v34 = vsel %vm550_vm3, %v547_v32, 0 }
 0x15a   : > { %1170 = vmatpush3.bf16.xpose.msra.mxu0 %v647_v34 }
 0x15b   : > { %1181 = vmatprep.subr.bf16.mxu0 %v1282_v1 }
 0x15d   : > { %1166 = vmatmul.mubr.msk.bf16.vlgmr.msra.gmra.mxu1 %vm550_vm3, %v542_v33 }
 0x15e   : > { %1176 = vmatpush3.bf16.xpose.msra.mxu1 %v693_v37  ;;  %1177 = vmatprep.mubr.msk.bf16.mxu1 %vm1283_vm0, %v1282_v1 }
 0x15f   : > { %1187 = vmatprep.subr.bf16.mxu1 %v1282_v1 }
 0x161   : > { %1172 = vmatmul.mubr.msk.bf16.vlgmr.msra.gmra.mxu0 %vm550_vm3, %v543_v38 }
 0x162   : > { %1183 = vmatprep.mubr.msk.bf16.mxu0 %vm1283_vm0, %v1282_v1 }
 0x165   : > { %1178 = vmatmul.mubr.msk.bf16.vlgmr.msra.gmra.mxu1 %vm550_vm3, %v544_v40 }
 0x166   : > { %1189 = vmatprep.mubr.msk.bf16.mxu1 %vm1283_vm0, %v1282_v1 }
 0x1aa   : > { %v591_v42 = vpop.f32.mrf.mxu0 }
 0x1ab   : > { %v592_v43 = vadd.f32 %v591_v42, %v549_v41 }
 0x1ac   : > { %v1161_v44 = vpop.f32.mrf.mxu0 }
 0x1ad   : > { %v735_v45 = vsel %vm550_vm3, %v592_v43, -inf }
 0x1ae   : > { %736 = vmax.xlane.f32.xlu0 %v735_v45  ;;  %v594_v46 = vpop.f32.mrf.mxu0 }
 0x1b0   : > { %v1162_v47 = vpop.f32.mrf.mxu0 }
 0x21d   : > { %v637_v48 = vpop.f32.mrf.mxu1 }
 0x21e   : > { %v638_v49 = vadd.f32 %v637_v48, %v549_v41 }
 0x21f   : > { %v1167_v50 = vpop.f32.mrf.mxu1 }
 0x220   : > { %v738_v51 = vsel %vm550_vm3, %v638_v49, -inf }
 0x221   : > { %v683_v52 = vpop.f32.mrf.mxu0  ;;  %739 = vmax.xlane.f32.xlu1 %v738_v51  ;;  %v640_v53 = vpop.f32.mrf.mxu1 }
 0x222   : > { %v684_v54 = vadd.f32 %v683_v52, %v549_v41 }
 0x223   : > { %v1168_v55 = vpop.f32.mrf.mxu1  ;;  %v1173_v56 = vpop.f32.mrf.mxu0 }
 0x224   : > { %v741_v57 = vsel %vm550_vm3, %v684_v54, -inf }
 0x225   : > { %742 = vmax.xlane.f32.xlu0 %v741_v57  ;;  %v686_v58 = vpop.f32.mrf.mxu0  ;;  %v729_v59 = vpop.f32.mrf.mxu1 }
 0x226   : > { %v730_v60 = vadd.f32 %v729_v59, %v549_v41 }
 0x227   : > { %v1174_v61 = vpop.f32.mrf.mxu0  ;;  %v1179_v62 = vpop.f32.mrf.mxu1 }
 0x228   : > { %v744_v63 = vsel %vm550_vm3, %v730_v60, -inf }
 0x229   : > { %745 = vmax.xlane.f32.xlu0 %v744_v63  ;;  %v732_v0 = vpop.f32.mrf.mxu1 }
 0x22b   : > { %v1180_v2 = vpop.f32.mrf.mxu1 }
 0x232   : > { %447 = vrot.lane.b32.xlu1 %v1394_v12, %s1287_s24 }
 0x237   : > { %v737_v3 = vpop.xlane.xlu0 %736 }
 0x238   : > { %v747_v4 = vsub.f32 %v592_v43, %v737_v3 }
 0x23a   : > { %v751_v5 = vmul.f32 1.442695, %v747_v4 }
 0x23c   : > { %1242 = vpow2.f32 %v751_v5 }
 0x249   : > { %v1243_v6 = vpop.eup %1242 }
 0x24a   : > { %v759_v7 = vsel %vm550_vm3, %v1243_v6, 0.0 }
 0x256   : > { %760 = vadd.xlane.f32.xlu1 %v759_v7 }
 0x2aa   : > { %v740_v8 = vpop.xlane.xlu1 %739 }
 0x2ab   : > { %v748_v9 = vsub.f32 %v638_v49, %v740_v8 }
 0x2ad   : > { %v753_v10 = vmul.f32 1.442695, %v748_v9 }
 0x2ae   : > { %v743_v11 = vpop.xlane.xlu0 %742  ;;  %v448_v13 = vpop.permute.xlu1 %447 }
 0x2af   : > { %1244 = vpow2.f32 %v753_v10  ;;  %v749_v14 = vsub.f32 %v684_v54, %v743_v11  ;;  %459 = vst.msk [vmem:[#allocation3] sm:$0xf] %vm430_vm2, %v448_v13 }
 0x2b1   : > { %v755_v15 = vmul.f32 1.442695, %v749_v14 }
 0x2b2   : > { %v746_v16 = vpop.xlane.xlu0 %745 }
 0x2b3   : > { %1246 = vpow2.f32 %v755_v15  ;;  %v750_v12 = vsub.f32 %v730_v60, %v746_v16 }
 0x2b5   : > { %v757_v17 = vmul.f32 1.442695, %v750_v12 }
 0x2b6   : > { %v783_v18 = vld [vmem:[#allocation3] sm:$0xf] }
 0x2b7   : > { %1248 = vpow2.f32 %v757_v17  ;;  %v792_v19 = vsel %vm790_vm4, %v783_v18, 0 }
 0x2b8   : > { %1182 = vmatpush3.bf16.msra.mxu0 %v792_v19 }
 0x2b9   : > { %1193 = vmatprep.subr.bf16.mxu0 %v1282_v1 }
 0x2bc   : > { %v1245_v20 = vpop.eup %1244 }
 0x2bd   : > { %v762_v21 = vsel %vm550_vm3, %v1245_v20, 0.0 }
 0x2be   : > { %763 = vadd.xlane.f32.xlu0 %v762_v21 }
 0x2c0   : > { %v1247_v22 = vpop.eup %1246 }
 0x2c1   : > { %v765_v23 = vsel %vm550_vm3, %v1247_v22, 0.0 }
 0x2c2   : > { %766 = vadd.xlane.f32.xlu1 %v765_v23 }
 0x2c4   : > { %v1249_v24 = vpop.eup %1248 }
 0x2c5   : > { %v768_v27 = vsel %vm550_vm3, %v1249_v24, 0.0 }
 0x2c6   : > { %769 = vadd.xlane.f32.xlu0 %v768_v27 }
 0x2d3   : > { %451 = vrot.lane.b32.xlu1 %v1411_v28, %s1287_s24 }
 0x2d7   : > { %453 = vrot.lane.b32.xlu1 %v1403_v25, %s1287_s24 }
 0x2dc   : > { %449 = vrot.lane.b32.xlu0 %v1405_v26, %s1287_s24 }
 0x2df   : > { %v761_v29 = vpop.xlane.xlu1 %760 }
 0x2e0   : > { %1250 = vrcp.f32 %v761_v29 }
 0x2ed   : > { %v1251_v30 = vpop.eup %1250 }
 0x2ee   : > { %v775_v31 = vmul.f32 %v1251_v30, %v1243_v6 }
 0x2f0   : > { %v779_v32 = vpack.c.bf16 %v775_v31, %v775_v31 }
 0x2f2   : > { %1184 = vmatmul.mubr.msk.bf16.vlgmr.msra.gmra.mxu0 %vm550_vm3, %v779_v32 }
 0x2f3   : > { %1195 = vmatprep.mubr.msk.bf16.mxu0 %vm1283_vm0, %v1282_v1 }
 0x347   : > { %v764_v33 = vpop.xlane.xlu0 %763 }
 0x348   : > { %1252 = vrcp.f32 %v764_v33 }
 0x34b   : > { %v767_v34 = vpop.xlane.xlu1 %766 }
 0x34c   : > { %1254 = vrcp.f32 %v767_v34 }
 0x34f   : > { %v452_v28 = vpop.permute.xlu1 %451  ;;  %v770_v35 = vpop.xlane.xlu0 %769 }
 0x350   : > { %461 = vst.msk [vmem:[#allocation3 + $0x8] sm:$0xf] %vm430_vm2, %v452_v28  ;;  %1256 = vrcp.f32 %v770_v35 }
 0x353   : > { %v454_v25 = vpop.permute.xlu1 %453  ;;  %v450_v26 = vpop.permute.xlu0 %449 }
 0x354   : > { %462 = vst.msk [vmem:[#allocation3 + $0xc] sm:$0xf] %vm430_vm2, %v454_v25  ;;  %460 = vst.msk [vmem:[#allocation3 + $0x4] sm:$0xf] %vm430_vm2, %v450_v26 }
 0x355   : > { %v1253_v36 = vpop.eup %1252 }
 0x356   : > { %v776_v41 = vmul.f32 %v1253_v36, %v1245_v20 }
 0x357   : > { %v785_v37 = vld [vmem:[#allocation3 + $0x8] sm:$0xf] }
 0x358   : > { %v884_v38 = vsel %vm790_vm4, %v785_v37, 0  ;;  %v780_v46 = vpack.c.bf16 %v776_v41, %v776_v41 }
 0x359   : > { %v1255_v39 = vpop.eup %1254  ;;  %1194 = vmatpush3.bf16.msra.mxu0 %v884_v38 }
 0x35a   : > { %v777_v40 = vmul.f32 %v1255_v39, %v1247_v22 }
 0x35b   : > { %v784_v42 = vld [vmem:[#allocation3 + $0x4] sm:$0xf]  ;;  %v786_v45 = vld [vmem:[#allocation3 + $0xc] sm:$0xf] }
 0x35c   : > { %v838_v43 = vsel %vm790_vm4, %v784_v42, 0  ;;  %v781_v44 = vpack.c.bf16 %v777_v40, %v777_v40  ;;  %v930_v48 = vsel %vm790_vm4, %v786_v45, 0 }
 0x35d   : > { %1188 = vmatpush3.bf16.msra.mxu1 %v838_v43  ;;  %v1257_v47 = vpop.eup %1256 }
 0x35e   : > { %1196 = vmatmul.mubr.msk.bf16.vlgmr.msra.gmra.mxu0 %vm550_vm3, %v781_v44  ;;  %1199 = vmatprep.subr.bf16.mxu1 %v1282_v1  ;;  %v778_v49 = vmul.f32 %v1257_v47, %v1249_v24 }
 0x360   : > { %1190 = vmatmul.mubr.msk.bf16.vlgmr.msra.gmra.mxu1 %vm550_vm3, %v780_v46  ;;  %v782_v50 = vpack.c.bf16 %v778_v49, %v778_v49 }
 0x361   : > { %1200 = vmatpush3.bf16.msra.mxu1 %v930_v48  ;;  %1201 = vmatprep.mubr.msk.bf16.mxu1 %vm1283_vm0, %v1282_v1 }
 0x368   : > { %1202 = vmatmul.mubr.msk.bf16.vlgmr.msra.gmra.mxu1 %vm550_vm3, %v782_v50 }
 0x3b2   : > { %v828_v51 = vpop.f32.mrf.mxu0 }
 0x3b4   : > { %v1185_v52 = vpop.f32.mrf.mxu0 }
 0x3b6   : > { %v831_v53 = vpop.f32.mrf.mxu0 }
 0x3b8   : > { %v1186_v54 = vpop.f32.mrf.mxu0 }
 0x41e   : > { %v920_v55 = vpop.f32.mrf.mxu0 }
 0x41f   : > { %977 = vrot.lane.b32.xlu1 %v920_v55, %s1288_s12 }
 0x420   : > { %v874_v56 = vpop.f32.mrf.mxu1  ;;  %v1197_v57 = vpop.f32.mrf.mxu0 }
 0x421   : > { %973 = vrot.lane.b32.xlu0 %v874_v56, %s1289_s14 }
 0x422   : > { %v1191_v58 = vpop.f32.mrf.mxu1  ;;  %v923_v59 = vpop.f32.mrf.mxu0 }
 0x424   : > { %v877_v60 = vpop.f32.mrf.mxu1  ;;  %v1198_v1 = vpop.f32.mrf.mxu0 }
 0x426   : > { %v1192_v61 = vpop.f32.mrf.mxu1 }
 0x428   : > { %v966_v62 = vpop.f32.mrf.mxu1 }
 0x429   : > { %981 = vrot.lane.b32.xlu0 %v966_v62, %s1290_s15 }
 0x42a   : > { %v1203_v63 = vpop.f32.mrf.mxu1 }
 0x42c   : > { %v969_v0 = vpop.f32.mrf.mxu1 }
 0x42e   : > { %v1204_v2 = vpop.f32.mrf.mxu1 }
 0x491   : > { %v978_v5 = vpop.permute.xlu1 %977 }
 0x493   : > { %v974_v3 = vpop.permute.xlu0 %973 }
 0x494   : > { %v984_v4 = vsel %vm550_vm3, %v828_v51, %v974_v3 }
 0x495   : > { %v986_v6 = vsel %vm985_vm5, %v984_v4, %v978_v5 }
 0x49b   : > { %v982_v7 = vpop.permute.xlu0 %981 }
 0x49c   : > { %v988_v8 = vsel %vm987_vm6, %v986_v6, %v982_v7 }
 0x49d   : > { %v989_v9 = vpack.c.bf16 %v988_v8, %v988_v8 }
 0x49f   : > { %991 = vst.msk [vmem:[%s341_s18] sm:$0xf] %vm990_vm7, %v989_v9 }
 0x4a0 PF: > { %s17_s26 = sadd.s32 1, %s1280_s26   ;;  %s1490_s24 = smov %s1276_s25 }
 0x4a1   : > { %p14_p5 = scmp.ge.s32.totalorder %s17_s26, 4   ;;  %s1491_s25 = smov %s1493_s27 }
 0x4a3   :  { %16 = sbr.rel (!%p14_p5) target bundleno = 2 (0x2), region = 88 }

</bundles_post_ra>
